<compile_context>
chip_gen: v7x
topology: tpu7x:2x2x1
jax: 0.10.0
libtpu: 0.0.40
codegen_flags: <defaults>
</compile_context>

<pallas_src>
import functools

import jax
import jax.numpy as jnp
from jax import lax
from jax.experimental import pallas as pl
from jax.experimental.pallas import tpu as pltpu


def _round_up(x, m):
    return ((x + m - 1) // m) * m


def _ff_kernel(x_ref, g_ref, be_ref, w1_ref, b1_ref, w2_ref, b2_ref,
               o_ref, xn_ref, *acc_scratch, d_true, d_pad):
    """Grid = (row tiles [parallel], hidden blocks [reduction])."""
    # When the output dtype is f32 we accumulate directly into o_ref (it is
    # resident across the h axis); otherwise an f32 VMEM scratch is used.
    acc_ref = acc_scratch[0] if acc_scratch else o_ref
    h_idx = pl.program_id(1)

    # --- once per row tile: LayerNorm (f32) + accumulator init (b2 folded) ---
    @pl.when(h_idx == 0)
    def _():
        x = x_ref[...].astype(jnp.float32)
        if d_pad != d_true:
            # D was zero-padded to a multiple of 128: masked statistics over
            # the true D columns only.
            col = lax.broadcasted_iota(jnp.int32, x.shape, 1)
            mask = (col < d_true).astype(jnp.float32)
            x = x * mask
            inv_d = 1.0 / float(d_true)
            mean = jnp.sum(x, axis=-1, keepdims=True) * inv_d
            diff = (x - mean) * mask
            var = jnp.sum(diff * diff, axis=-1, keepdims=True) * inv_d
        else:
            mean = jnp.mean(x, axis=-1, keepdims=True)
            diff = x - mean
            var = jnp.mean(diff * diff, axis=-1, keepdims=True)
        xn = (x - mean) * lax.rsqrt(var + 1e-5)  # torch LayerNorm default eps
        xn = xn * g_ref[...].astype(jnp.float32) + be_ref[...].astype(jnp.float32)
        xn_ref[...] = xn.astype(xn_ref.dtype)    # bf16 for the MXU
        # Fold the second linear's bias into the accumulator init.
        acc_ref[...] = jnp.broadcast_to(
            b2_ref[...].astype(jnp.float32), acc_ref.shape).astype(acc_ref.dtype)

    # --- Linear(dim -> hidden block) + SiLU, bf16 MXU inputs, f32 math ---
    h = jnp.dot(xn_ref[...], w1_ref[...],
                preferred_element_type=jnp.float32) + b1_ref[...].astype(jnp.float32)
    h = h * jax.nn.sigmoid(h)  # SiLU (sigmoid goes to EUP)
    # Dropout(p=0.0) -> identity in forward.

    # --- Linear(hidden block -> dim), accumulated over hidden blocks ---
    acc_ref[...] += jnp.dot(h.astype(w2_ref.dtype), w2_ref[...],
                            preferred_element_type=jnp.float32).astype(acc_ref.dtype)
    # Dropout(p=0.0) -> identity in forward.

    if acc_scratch:  # only when accumulating in a scratch (non-f32 output)
        @pl.when(h_idx == pl.num_programs(1) - 1)
        def _():
            o_ref[...] = acc_ref[...].astype(o_ref.dtype)


def _vmem_block_bytes(tm, th, d_pad, x_itemsize, out_itemsize, use_acc):
    """Rough VMEM usage: double-buffered blocks + scratch + hidden temporary."""
    b = 2 * tm * d_pad * x_itemsize            # x row tile (double-buffered)
    b += 2 * tm * d_pad * out_itemsize         # output row tile (double-buffered)
    b += 2 * 2 * d_pad * th * 2                # W1 + W2 bf16 blocks (double-buffered)
    b += tm * d_pad * 2                        # normalized-x scratch (bf16)
    if use_acc:
        b += tm * d_pad * 4                    # f32 accumulator scratch
    b += tm * th * 4                           # hidden activation temporary (f32)
    b += 2 * (3 * d_pad + th) * 4              # gamma/beta/b2 + b1 blocks
    return b


def make_feed_forward(gamma, beta, w1, b1, w2, b2, *,
                      tile_m=None, tile_h=1024, out_dtype=None):
    """Pad + bf16-cast the parameters ONCE; returns apply(x) for (B, N, D) x."""
    D, H = int(w1.shape[0]), int(w1.shape[1])
    d_pad = _round_up(D, 128)
    h128 = _round_up(H, 128)

    try:
        info = pltpu.get_tpu_info()
        vmem_cap = int(getattr(info, "vmem_capacity_bytes", 64 * 1024 * 1024))
    except Exception:
        vmem_cap = 64 * 1024 * 1024            # conservative (v7x per-TC VMEM)
    budget = int(0.70 * vmem_cap)

    if tile_m is None:
        # 64 MiB parts (v7x) -> smaller row tiles; 128 MiB parts (v5e/v6e) can
        # afford larger tiles for better weight amortization / MXU-bound ops.
        tile_m = 512 if vmem_cap <= 64 * 1024 * 1024 else 768

    # Weight residency: if both bf16 weights fit (double-buffered) well inside
    # the budget, use a single hidden block -> weight block index is constant
    # over the whole grid and W1/W2 are fetched from HBM exactly once.
    resident_weight_bytes = 2 * 2 * d_pad * h128 * 2
    if resident_weight_bytes <= budget // 2:
        th = h128
    else:
        th = min(_round_up(tile_h, 128), h128)
    h_pad = _round_up(H, th)
    weights_resident = (h_pad // th == 1)

    # Parameter preparation hoisted out of the per-call path.
    g2 = jnp.pad(gamma.astype(jnp.float32), (0, d_pad - D)).reshape(1, d_pad)
    be2 = jnp.pad(beta.astype(jnp.float32), (0, d_pad - D)).reshape(1, d_pad)
    w1p = jnp.pad(w1, ((0, d_pad - D), (0, h_pad - H))).astype(jnp.bfloat16)
    b1p = jnp.pad(b1.astype(jnp.float32), (0, h_pad - H)).reshape(1, h_pad)
    w2p = jnp.pad(w2, ((0, h_pad - H), (0, d_pad - D))).astype(jnp.bfloat16)
    b2p = jnp.pad(b2.astype(jnp.float32), (0, d_pad - D)).reshape(1, d_pad)

    kernel = functools.partial(_ff_kernel, d_true=D, d_pad=d_pad)

    def apply(x):
        assert x.shape[-1] == D, f"expected last dim {D}, got {x.shape}"
        B, N, _ = x.shape
        M = B * N
        out_dt = jnp.dtype(out_dtype or x.dtype)
        use_acc = out_dt != jnp.dtype(jnp.float32)
        x_isz = jnp.dtype(x.dtype).itemsize
        o_isz = out_dt.itemsize

        # Row tile: >= 16 (bf16 scratch minimum sublane tile); shrink to budget.
        tm = min(_round_up(tile_m, 16), _round_up(M, 16))
        while tm > 16 and _vmem_block_bytes(tm, th, d_pad, x_isz, o_isz, use_acc) > budget:
            tm = max(16, _round_up(tm // 2, 16))
        # Megacore friendliness (v7x has 2 TCs): when weights are resident,
        # splitting rows costs no extra weight traffic, so avoid a 1-tile grid.
        if weights_resident and M > 32 and _round_up(M, tm) // tm == 1:
            tm = max(16, _round_up((M + 1) // 2, 16))
        m_pad = _round_up(M, tm)

        x2 = x.reshape(M, D)
        if m_pad != M or d_pad != D:
            x2 = jnp.pad(x2, ((0, m_pad - M), (0, d_pad - D)))

        n_row_tiles = m_pad // tm
        n_h_blocks = h_pad // th
        grid = (n_row_tiles, n_h_blocks)

        need = _vmem_block_bytes(tm, th, d_pad, x_isz, o_isz, use_acc)
        vmem_limit = min(int(vmem_cap * 0.9),
                         max(int(need * 1.3) + (2 << 20), 16 << 20))

        weight_fetches = 1 if weights_resident else n_row_tiles
        cost = pl.CostEstimate(
            flops=int(4 * M * D * H + 10 * M * D),
            transcendentals=int(M * H + M),
            bytes_accessed=int(m_pad * d_pad * x_isz                 # x in
                               + m_pad * d_pad * o_isz               # y out
                               + weight_fetches * 2 * d_pad * h_pad * 2  # bf16 weights
                               + (3 * d_pad + h_pad) * 4),           # params
        )

        scratch = [pltpu.VMEM((tm, d_pad), jnp.bfloat16)]            # normalized x
        if use_acc:
            scratch.append(pltpu.VMEM((tm, d_pad), jnp.float32))     # f32 accumulator

        out = pl.pallas_call(
            kernel,
            out_shape=jax.ShapeDtypeStruct((m_pad, d_pad), out_dt),
            grid_spec=pltpu.PrefetchScalarGridSpec(
                num_scalar_prefetch=0,
                grid=grid,
                in_specs=[
                    pl.BlockSpec((tm, d_pad), lambda i, h: (i, 0)),   # x row tile
                    pl.BlockSpec((1, d_pad), lambda i, h: (0, 0)),    # gamma
                    pl.BlockSpec((1, d_pad), lambda i, h: (0, 0)),    # beta
                    pl.BlockSpec((d_pad, th), lambda i, h: (0, h)),   # W1 block
                    pl.BlockSpec((1, th), lambda i, h: (0, h)),       # b1 block
                    pl.BlockSpec((th, d_pad), lambda i, h: (h, 0)),   # W2 block
                    pl.BlockSpec((1, d_pad), lambda i, h: (0, 0)),    # b2
                ],
                out_specs=pl.BlockSpec((tm, d_pad), lambda i, h: (i, 0)),
                scratch_shapes=scratch,
            ),
            compiler_params=pltpu.CompilerParams(
                dimension_semantics=("parallel", "arbitrary"),
                vmem_limit_bytes=vmem_limit,
            ),
            cost_estimate=cost,
        )(x2, g2, be2, w1p, b1p, w2p, b2p)

        if m_pad != M or d_pad != D:
            out = out[:M, :D]
        return out.reshape(B, N, D)

    return apply


def feed_forward(x, gamma, beta, w1, b1, w2, b2, **kwargs):
    """One-shot convenience wrapper (parameter prep not hoisted)."""
    return make_feed_forward(gamma, beta, w1, b1, w2, b2, **kwargs)(x)


def feed_forward_ref(x, gamma, beta, w1, b1, w2, b2):
    xf = x.astype(jnp.float32)
    mean = jnp.mean(xf, axis=-1, keepdims=True)
    var = jnp.mean((xf - mean) ** 2, axis=-1, keepdims=True)
    xn = (xf - mean) * lax.rsqrt(var + 1e-5) * gamma + beta
    h = xn @ w1 + b1
    h = h * jax.nn.sigmoid(h)
    return (h @ w2 + b2).astype(x.dtype)


if __name__ == "__main__":
    B, N, D, H = 2, 8, 32, 64  # batch=2, seq=8, dim=32, hidden_dim=64

    key = jax.random.PRNGKey(0)
    kx, kw1, kb1, kw2, kb2 = jax.random.split(key, 5)

    x = jax.random.normal(kx, (B, N, D), dtype=jnp.float32)

    gamma = jnp.ones((D,), dtype=jnp.float32)
    beta = jnp.zeros((D,), dtype=jnp.float32)
    w1 = jax.random.normal(kw1, (D, H), dtype=jnp.float32) * 0.05
    b1 = jax.random.normal(kb1, (H,), dtype=jnp.float32) * 0.01
    w2 = jax.random.normal(kw2, (H, D), dtype=jnp.float32) * 0.05
    b2 = jax.random.normal(kb2, (D,), dtype=jnp.float32) * 0.01

    ff = make_feed_forward(gamma, beta, w1, b1, w2, b2)  # params padded/cast once
    out = jax.block_until_ready(ff(x))

    ref = feed_forward_ref(x, gamma, beta, w1, b1, w2, b2)
    assert out.shape == (B, N, D)
    # bf16 MXU inputs with f32 accumulation -> slightly looser tolerance than pure f32.
    assert jnp.allclose(out, ref, atol=1e-2, rtol=1e-2), float(jnp.max(jnp.abs(out - ref)))

    print("KERNEL_OK")
</pallas_src>

<mosaic_0001>
module attributes {stable_mosaic.version = 11 : i64} {
  func.func @_ff_kernel(%arg0: i32, %arg1: i32, %arg2: memref<16x128xf32, #tpu.memory_space<vmem>>, %arg3: memref<1x128xf32, #tpu.memory_space<vmem>>, %arg4: memref<1x128xf32, #tpu.memory_space<vmem>>, %arg5: memref<128x128xbf16, #tpu.memory_space<vmem>>, %arg6: memref<1x128xf32, #tpu.memory_space<vmem>>, %arg7: memref<128x128xbf16, #tpu.memory_space<vmem>>, %arg8: memref<1x128xf32, #tpu.memory_space<vmem>>, %arg9: memref<16x128xf32, #tpu.memory_space<vmem>>, %arg10: memref<16x128xbf16, #tpu.memory_space<vmem>>) attributes {dimension_semantics = [#tpu.dimension_semantics<parallel>, #tpu.dimension_semantics<arbitrary>], iteration_bounds = array<i64: 1, 1>, scalar_prefetch = 0 : i64, scratch_operands = 1 : i64, tpu.core_type = #tpu.core_type<tc>, window_params = [{transform_indices = @transform_0, window_bounds = array<i64: 16, 128>}, {pipeline_mode = #tpu.pipeline_mode<synchronous>, transform_indices = @transform_1, window_bounds = array<i64: 1, 128>}, {pipeline_mode = #tpu.pipeline_mode<synchronous>, transform_indices = @transform_2, window_bounds = array<i64: 1, 128>}, {transform_indices = @transform_3, window_bounds = array<i64: 128, 128>}, {transform_indices = @transform_4, window_bounds = array<i64: 1, 128>}, {transform_indices = @transform_5, window_bounds = array<i64: 128, 128>}, {pipeline_mode = #tpu.pipeline_mode<synchronous>, transform_indices = @transform_6, window_bounds = array<i64: 1, 128>}, {transform_indices = @transform_7, window_bounds = array<i64: 16, 128>}]} {
    %c0_i32 = arith.constant 0 : i32
    %0 = arith.cmpi eq, %arg1, %c0_i32 : i32
    %1 = arith.extui %0 : i1 to i32
    %c0_i32_0 = arith.constant 0 : i32
    %2 = arith.cmpi ne, %1, %c0_i32_0 : i32
    scf.if %2 {
      %c0_14 = arith.constant 0 : index
      %c0_15 = arith.constant 0 : index
      %21 = vector.load %arg2[%c0_14, %c0_15] : memref<16x128xf32, #tpu.memory_space<vmem>>, vector<16x128xf32>
      %22 = tpu.iota {dimensions = array<i32: 1>} : vector<16x128xi32>
      %c32_i32 = arith.constant 32 : i32
      %23 = vector.broadcast %c32_i32 : i32 to vector<16x128xi32>
      %24 = arith.cmpi slt, %22, %23 : vector<16x128xi32>
      %25 = arith.extui %24 : vector<16x128xi1> to vector<16x128xi32>
      %26 = arith.sitofp %25 : vector<16x128xi32> to vector<16x128xf32>
      %27 = arith.mulf %21, %26 : vector<16x128xf32>
      %cst_16 = arith.constant dense<0.000000e+00> : vector<16xf32>
      %28 = vector.multi_reduction <add>, %27, %cst_16 [1] : vector<16x128xf32> to vector<16xf32>
      %29 = vector.shape_cast %28 : vector<16xf32> to vector<16x1xf32>
      %cst_17 = arith.constant 3.125000e-02 : f32
      %30 = vector.broadcast %cst_17 : f32 to vector<16x1xf32>
      %31 = arith.mulf %29, %30 : vector<16x1xf32>
      %32 = vector.broadcast %31 : vector<16x1xf32> to vector<16x128xf32>
      %33 = arith.subf %27, %32 : vector<16x128xf32>
      %34 = arith.mulf %33, %26 : vector<16x128xf32>
      %35 = arith.mulf %34, %34 : vector<16x128xf32>
      %cst_18 = arith.constant dense<0.000000e+00> : vector<16xf32>
      %36 = vector.multi_reduction <add>, %35, %cst_18 [1] : vector<16x128xf32> to vector<16xf32>
      %37 = vector.shape_cast %36 : vector<16xf32> to vector<16x1xf32>
      %cst_19 = arith.constant 3.125000e-02 : f32
      %38 = vector.broadcast %cst_19 : f32 to vector<16x1xf32>
      %39 = arith.mulf %37, %38 : vector<16x1xf32>
      %40 = vector.broadcast %31 : vector<16x1xf32> to vector<16x128xf32>
      %41 = arith.subf %27, %40 : vector<16x128xf32>
      %cst_20 = arith.constant 9.99999974E-6 : f32
      %42 = vector.broadcast %cst_20 : f32 to vector<16x1xf32>
      %43 = arith.addf %39, %42 : vector<16x1xf32>
      %44 = math.rsqrt %43 : vector<16x1xf32>
      %45 = vector.broadcast %44 : vector<16x1xf32> to vector<16x128xf32>
      %46 = arith.mulf %41, %45 : vector<16x128xf32>
      %c0_21 = arith.constant 0 : index
      %c0_22 = arith.constant 0 : index
      %47 = vector.load %arg3[%c0_21, %c0_22] : memref<1x128xf32, #tpu.memory_space<vmem>>, vector<1x128xf32>
      %48 = vector.broadcast %47 : vector<1x128xf32> to vector<16x128xf32>
      %49 = arith.mulf %46, %48 : vector<16x128xf32>
      %c0_23 = arith.constant 0 : index
      %c0_24 = arith.constant 0 : index
      %50 = vector.load %arg4[%c0_23, %c0_24] : memref<1x128xf32, #tpu.memory_space<vmem>>, vector<1x128xf32>
      %51 = vector.broadcast %50 : vector<1x128xf32> to vector<16x128xf32>
      %52 = arith.addf %49, %51 : vector<16x128xf32>
      %53 = arith.truncf %52 : vector<16x128xf32> to vector<16x128xbf16>
      %c0_25 = arith.constant 0 : index
      %c0_26 = arith.constant 0 : index
      %54 = vector.load %arg10[%c0_25, %c0_26] : memref<16x128xbf16, #tpu.memory_space<vmem>>, vector<16x128xbf16>
      tpu.vector_store %arg10[%c0_25, %c0_26], %53 {strides = array<i32>} : memref<16x128xbf16, #tpu.memory_space<vmem>>, vector<16x128xbf16>,
      %c0_27 = arith.constant 0 : index
      %c0_28 = arith.constant 0 : index
      %55 = vector.load %arg8[%c0_27, %c0_28] : memref<1x128xf32, #tpu.memory_space<vmem>>, vector<1x128xf32>
      %56 = vector.shape_cast %55 : vector<1x128xf32> to vector<1x128xf32>
      %57 = vector.broadcast %56 : vector<1x128xf32> to vector<16x128xf32>
      %c0_29 = arith.constant 0 : index
      %c0_30 = arith.constant 0 : index
      %58 = vector.load %arg9[%c0_29, %c0_30] : memref<16x128xf32, #tpu.memory_space<vmem>>, vector<16x128xf32>
      tpu.vector_store %arg9[%c0_29, %c0_30], %57 {strides = array<i32>} : memref<16x128xf32, #tpu.memory_space<vmem>>, vector<16x128xf32>,
    } else {
    }
    %c0 = arith.constant 0 : index
    %c0_1 = arith.constant 0 : index
    %3 = vector.load %arg10[%c0, %c0_1] : memref<16x128xbf16, #tpu.memory_space<vmem>>, vector<16x128xbf16>
    %c0_2 = arith.constant 0 : index
    %c0_3 = arith.constant 0 : index
    %4 = vector.load %arg5[%c0_2, %c0_3] : memref<128x128xbf16, #tpu.memory_space<vmem>>, vector<128x128xbf16>
    %cst = arith.constant dense<0.000000e+00> : vector<16x128xf32>
    %5 = tpu.matmul %3, %4, %cst {dimension_numbers = #tpu.dot_dimension_numbers<[1], [0], [0], [1], [0, 0, 1, 1], [], []>} : vector<16x128xbf16>, vector<128x128xbf16>, vector<16x128xf32> -> vector<16x128xf32>
    %c0_4 = arith.constant 0 : index
    %c0_5 = arith.constant 0 : index
    %6 = vector.load %arg6[%c0_4, %c0_5] : memref<1x128xf32, #tpu.memory_space<vmem>>, vector<1x128xf32>
    %7 = vector.broadcast %6 : vector<1x128xf32> to vector<16x128xf32>
    %8 = arith.addf %5, %7 : vector<16x128xf32>
    %9 = arith.negf %8 : vector<16x128xf32>
    %10 = math.exp %9 : vector<16x128xf32>
    %cst_6 = arith.constant 1.000000e+00 : f32
    %11 = vector.broadcast %cst_6 : f32 to vector<16x128xf32>
    %12 = arith.addf %11, %10 : vector<16x128xf32>
    %13 = arith.divf %11, %12 : vector<16x128xf32>
    %14 = arith.mulf %8, %13 : vector<16x128xf32>
    %c0_7 = arith.constant 0 : index
    %c0_8 = arith.constant 0 : index
    %15 = vector.load %arg9[%c0_7, %c0_8] : memref<16x128xf32, #tpu.memory_space<vmem>>, vector<16x128xf32>
    %16 = arith.truncf %14 : vector<16x128xf32> to vector<16x128xbf16>
    %c0_9 = arith.constant 0 : index
    %c0_10 = arith.constant 0 : index
    %17 = vector.load %arg7[%c0_9, %c0_10] : memref<128x128xbf16, #tpu.memory_space<vmem>>, vector<128x128xbf16>
    %cst_11 = arith.constant dense<0.000000e+00> : vector<16x128xf32>
    %18 = tpu.matmul %16, %17, %cst_11 {dimension_numbers = #tpu.dot_dimension_numbers<[1], [0], [0], [1], [0, 0, 1, 1], [], []>} : vector<16x128xbf16>, vector<128x128xbf16>, vector<16x128xf32> -> vector<16x128xf32>
    %19 = arith.addf %15, %18 : vector<16x128xf32>
    %c0_12 = arith.constant 0 : index
    %c0_13 = arith.constant 0 : index
    %20 = vector.load %arg9[%c0_12, %c0_13] : memref<16x128xf32, #tpu.memory_space<vmem>>, vector<16x128xf32>
    tpu.vector_store %arg9[%c0_12, %c0_13], %19 {strides = array<i32>} : memref<16x128xf32, #tpu.memory_space<vmem>>, vector<16x128xf32>,
    return
  }
  func.func @transform_0(%arg0: i32, %arg1: i32) -> (i32, i32) {
    %c0_i32 = arith.constant 0 : i32
    %c0_i32_0 = arith.constant 0 : i32
    return %arg0, %c0_i32 : i32, i32
  }
  func.func @transform_1(%arg0: i32, %arg1: i32) -> (i32, i32) {
    %c0_i32 = arith.constant 0 : i32
    %c0_i32_0 = arith.constant 0 : i32
    %c0_i32_1 = arith.constant 0 : i32
    return %c0_i32, %c0_i32_0 : i32, i32
  }
  func.func @transform_2(%arg0: i32, %arg1: i32) -> (i32, i32) {
    %c0_i32 = arith.constant 0 : i32
    %c0_i32_0 = arith.constant 0 : i32
    %c0_i32_1 = arith.constant 0 : i32
    return %c0_i32, %c0_i32_0 : i32, i32
  }
  func.func @transform_3(%arg0: i32, %arg1: i32) -> (i32, i32) {
    %c0_i32 = arith.constant 0 : i32
    %c0_i32_0 = arith.constant 0 : i32
    return %c0_i32, %arg1 : i32, i32
  }
  func.func @transform_4(%arg0: i32, %arg1: i32) -> (i32, i32) {
    %c0_i32 = arith.constant 0 : i32
    %c0_i32_0 = arith.constant 0 : i32
    return %c0_i32, %arg1 : i32, i32
  }
  func.func @transform_5(%arg0: i32, %arg1: i32) -> (i32, i32) {
    %c0_i32 = arith.constant 0 : i32
    %c0_i32_0 = arith.constant 0 : i32
    return %arg1, %c0_i32 : i32, i32
  }
  func.func @transform_6(%arg0: i32, %arg1: i32) -> (i32, i32) {
    %c0_i32 = arith.constant 0 : i32
    %c0_i32_0 = arith.constant 0 : i32
    %c0_i32_1 = arith.constant 0 : i32
    return %c0_i32, %c0_i32_0 : i32, i32
  }
  func.func @transform_7(%arg0: i32, %arg1: i32) -> (i32, i32) {
    %c0_i32 = arith.constant 0 : i32
    %c0_i32_0 = arith.constant 0 : i32
    return %arg0, %c0_i32 : i32, i32
  }
}

</mosaic_0001>

<bundles_post_ra>
// kernel: tpu_custom_call.1
= control target key start
LH: loop header
LB: loop body
LE: loop exit
PB: predicated region body
PF: predicated region fallthrough
CT: control target
= control target key end

     0   :  { %12 = vsyncpa [#allocation4], 0  ;;  %s746_s0 = inlined_call_operand.hbm [shape: f32[16,128], index: 0, kind: input, shape index: {}]   ;;  %s747_s1 = inlined_call_operand.vmem [shape: f32[1,128], index: 1, kind: input, shape index: {}]   ;;  %s748_s2 = inlined_call_operand.vmem [shape: f32[1,128], index: 2, kind: input, shape index: {}]   ;;  %s749_s3 = inlined_call_operand.hbm [shape: bf16[128,128], index: 3, kind: input, shape index: {}]   ;;  %s750_s4 = inlined_call_operand.vmem [shape: f32[1,128], index: 4, kind: input, shape index: {}]   ;;  %s751_s5 = inlined_call_operand.hbm [shape: bf16[128,128], index: 5, kind: input, shape index: {}]   ;;  %s752_s6 = inlined_call_operand.vmem [shape: f32[1,128], index: 6, kind: input, shape index: {}]   ;;  %s753_s7 = inlined_call_operand.hbm [shape: f32[16,128], index: 7, kind: output, shape index: {}]  }
   0x1   :  { %13 = vsyncpa [#allocation7], 0 }
   0x2   :  { %14 = vsyncpa [#allocation5], 0  ;;  %s605_s24 = smov [#allocation6]   ;;  %s511_s28 = scalar_lea.hbm %s749_s3, 1024 }
   0x3   :  { %s36_s25 = sshll.u32 %s605_s24, 4  ;;  %p512_p0 = scmp.ne.s32.totalorder %s749_s3, %s511_s28  ;;  %s37_s25 = int_to_ptr.vmem [resolvable:$true] %s36_s25 }
   0x4   :  { %p515_p1 = scmp.lt.u32.totalorder %s511_s28, %s749_s3 }
   0x6   :  { %p517_p2 = pnand %p515_p1, %p512_p0 }
   0x8   :  { %520 = shalt.err (!%p517_p2)
}
   0x9   :  { %s521_s10 = scalar_lea.vmem %s37_s25, 1024  ;;  %p526_p4 = scmp.lt.s32.totalorder %s37_s25, %s37_s25 }
   0xa   :  { %p522_p3 = scmp.ne.s32.totalorder %s37_s25, %s521_s10  ;;  %p527_p5 = scmp.lt.s32.totalorder %s521_s10, %s521_s10 }
   0xc   :  { %p528_p6 = por %p527_p5, %p526_p4 }
   0xe   :  { %p529_p7 = pnand %p528_p6, %p522_p3 }
  0x10   :  { %532 = shalt.err (!%p529_p7)
}
  0x11   :  { %s606_s11 = smov 64   ;;  %s607_s12 = smov 4  }
  0x12   :  { %42 = dma.hbm_to_vmem [thread:$0]  %s749_s3, 1024, %s37_s25, [#allocation7], %s606_s11, %s606_s11, %s607_s12  }
  0x13   :  { %s608_s15 = smov [#allocation3]   ;;  %s533_s19 = scalar_lea.hbm %s746_s0, 256 }
  0x14   :  { %s20_s16 = sshll.u32 %s608_s15, 4  ;;  %p534_p8 = scmp.ne.s32.totalorder %s746_s0, %s533_s19  ;;  %s21_s16 = int_to_ptr.vmem [resolvable:$true] %s20_s16 }
  0x15   :  { %p537_p9 = scmp.lt.u32.totalorder %s533_s19, %s746_s0 }
  0x17   :  { %p539_p10 = pnand %p537_p9, %p534_p8 }
  0x19   :  { %542 = shalt.err (!%p539_p10)
}
  0x1a   :  { %s543_s24 = scalar_lea.vmem %s21_s16, 256  ;;  %p548_p12 = scmp.lt.s32.totalorder %s21_s16, %s21_s16 }
  0x1b   :  { %p544_p11 = scmp.ne.s32.totalorder %s21_s16, %s543_s24  ;;  %p549_p13 = scmp.lt.s32.totalorder %s543_s24, %s543_s24 }
  0x1d   :  { %p550_p0 = por %p549_p13, %p548_p12 }
  0x1f   :  { %p551_p1 = pnand %p550_p0, %p544_p11 }
  0x21   :  { %554 = shalt.err (!%p551_p1)
}
  0x22   :  { %s609_s3 = smov 128   ;;  %s610_s25 = smov 8  }
  0x23   :  { %26 = dma.hbm_to_vmem [thread:$0]  %s746_s0, 256, %s21_s16, [#allocation4], %s609_s3, %s609_s3, %s610_s25  }
  0x24   :  { %s611_s28 = smov [#allocation8]   ;;  %s555_s9 = scalar_lea.hbm %s751_s5, 1024 }
  0x25   :  { %s50_s29 = sshll.u32 %s611_s28, 4  ;;  %p556_p2 = scmp.ne.s32.totalorder %s751_s5, %s555_s9  ;;  %s51_s29 = int_to_ptr.vmem [resolvable:$true] %s50_s29 }
  0x26   :  { %p559_p3 = scmp.lt.u32.totalorder %s555_s9, %s751_s5 }
  0x28   :  { %p561_p4 = pnand %p559_p3, %p556_p2 }
  0x2a   :  { %564 = shalt.err (!%p561_p4)
}
  0x2b   :  { %s565_s17 = scalar_lea.vmem %s51_s29, 1024  ;;  %p570_p6 = scmp.lt.s32.totalorder %s51_s29, %s51_s29 }
  0x2c   :  { %p566_p5 = scmp.ne.s32.totalorder %s51_s29, %s565_s17  ;;  %p571_p7 = scmp.lt.s32.totalorder %s565_s17, %s565_s17 }
  0x2e   :  { %p572_p8 = por %p571_p7, %p570_p6 }
  0x30   :  { %p573_p9 = pnand %p572_p8, %p566_p5 }
  0x32   :  { %576 = shalt.err (!%p573_p9)
}
  0x33   :  { %56 = dma.hbm_to_vmem [thread:$0]  %s751_s5, 1024, %s51_s29, [#allocation7], %s606_s11, %s606_s11, %s607_s12  }
  0x34   :  { %599 = dma.done.wait [#allocation4], 256  }
  0x35   :  { %600 = vsyncadd [#allocation4], 4294967040 }
  0x36   :  { %601 = dma.done.wait [#allocation7], 2048  }
  0x37   :  { %602 = vsyncadd [#allocation7], 4294965248  ;;  %v75_v0 = vlaneseq  ;;  %v612_v1 = vmov 0.0   ;;  %v73_v4 = vld [vmem:[#allocation3] sm:$0xff]  ;;  %v74_v5 = vld [vmem:[#allocation3 + $0x8] sm:$0xff]  ;;  %vm613_vm1 = vmmov 0  }
  0x38   :  { %433 = vmatprep.subr.bf16.mxu0 %v612_v1  ;;  %453 = vmatprep.subr.bf16.mxu1 %v612_v1  ;;  %v483_v8 = vld [vmem:[#allocation6] sm:$0xff]   ;;  %v484_v19 = vld [vmem:[#allocation6 + $0x8] sm:$0xff]   ;;  %v485_v20 = vld [vmem:[#allocation6 + $0x10] sm:$0xff]   ;;  %s614_s20 = smov [#allocation9]  }
  0x39   :  { %v76_v2 = vand.u32 127, %v75_v0  ;;  %434 = vmatpush3.bf16.msra.mxu0 %v483_v8  ;;  %v486_v21 = vld [vmem:[#allocation6 + $0x18] sm:$0xff]   ;;  %v487_v22 = vld [vmem:[#allocation6 + $0x20] sm:$0xff]   ;;  %449 = vmatprep.mubr.msk.bf16.mxu0 %vm613_vm1, %v612_v1  ;;  %v488_v23 = vld [vmem:[#allocation6 + $0x28] sm:$0xff]   ;;  %s379_s21 = sshll.u32 %s614_s20, 4  ;;  %s380_s21 = int_to_ptr.vmem [resolvable:$true] %s379_s21 }
  0x3a   :  { %435 = vmatprep.subr.bf16.mxu0 %v612_v1  ;;  %469 = vmatprep.mubr.msk.bf16.mxu1 %vm613_vm1, %v612_v1  ;;  %v489_v24 = vld [vmem:[#allocation6 + $0x30] sm:$0xff]   ;;  %v490_v25 = vld [vmem:[#allocation6 + $0x38] sm:$0xff]   ;;  %v491_v43 = vld [vmem:[#allocation8] sm:$0xff]   ;;  %s577_s22 = scalar_lea.vmem %s380_s21, 256  ;;  %p582_p11 = scmp.lt.s32.totalorder %s380_s21, %s380_s21 }
  0x3b   :  { %vm77_vm0 = vcmp.lt.s32.totalorder %v76_v2, 32  ;;  %v393_v34 = vld [vmem:[%s747_s1] ss:$0 sm:$0xff]  ;;  %454 = vmatpush3.bf16.msra.mxu1 %v491_v43  ;;  %v492_v44 = vld [vmem:[#allocation8 + $0x8] sm:$0xff]   ;;  %v494_v46 = vld [vmem:[#allocation8 + $0x18] sm:$0xff]   ;;  %p578_p10 = scmp.ne.s32.totalorder %s380_s21, %s577_s22  ;;  %p583_p12 = scmp.lt.s32.totalorder %s577_s22, %s577_s22 }
  0x3c   :  { %v392_v3 = vsel %vm77_vm0, 1.0, %v612_v1  ;;  %v394_v38 = vld [vmem:[%s748_s2] ss:$0 sm:$0xff]  ;;  %455 = vmatprep.subr.bf16.mxu1 %v612_v1  ;;  %v495_v47 = vld [vmem:[#allocation8 + $0x20] sm:$0xff]   ;;  %v496_v48 = vld [vmem:[#allocation8 + $0x28] sm:$0xff]  }
  0x3d   :  { %v80_v6 = vmul.f32 %v392_v3, %v73_v4  ;;  %v81_v7 = vmul.f32 %v392_v3, %v74_v5  ;;  %436 = vmatpush3.bf16.msra.mxu0 %v484_v19  ;;  %v493_v45 = vld [vmem:[#allocation8 + $0x10] sm:$0xff]   ;;  %v498_v50 = vld [vmem:[#allocation8 + $0x38] sm:$0xff]   ;;  %p584_p13 = por %p583_p12, %p582_p11 }
  0x3e   :  { %437 = vmatprep.subr.bf16.mxu0 %v612_v1  ;;  %v497_v49 = vld [vmem:[#allocation8 + $0x30] sm:$0xff]  }
  0x3f   :  { %82 = vadd.xlane.f32.xlu0 %v80_v6  ;;  %456 = vmatpush3.bf16.msra.mxu1 %v492_v44  ;;  %v396_v51 = vld [vmem:[%s750_s4] ss:$0 sm:$0xff]  ;;  %p585_p0 = pnand %p584_p13, %p578_p10 }
  0x40   :  { %457 = vmatprep.subr.bf16.mxu1 %v612_v1  ;;  %v395_v5 = vld [vmem:[%s752_s6] ss:$0 sm:$0xff] }
  0x41   :  { %438 = vmatpush3.bf16.msra.mxu0 %v485_v20 }
  0x42   :  { %439 = vmatprep.subr.bf16.mxu0 %v612_v1 }
  0x43   :  { %84 = vadd.xlane.f32.xlu0 %v81_v7  ;;  %458 = vmatpush3.bf16.msra.mxu1 %v493_v45 }
  0x44   :  { %459 = vmatprep.subr.bf16.mxu1 %v612_v1 }
  0x45   :  { %440 = vmatpush3.bf16.msra.mxu0 %v486_v21 }
  0x46   :  { %441 = vmatprep.subr.bf16.mxu0 %v612_v1 }
  0x47   :  { %460 = vmatpush3.bf16.msra.mxu1 %v494_v46 }
  0x48   :  { %461 = vmatprep.subr.bf16.mxu1 %v612_v1 }
  0x49   :  { %442 = vmatpush3.bf16.msra.mxu0 %v487_v22 }
  0x4a   :  { %443 = vmatprep.subr.bf16.mxu0 %v612_v1 }
  0x4b   :  { %462 = vmatpush3.bf16.msra.mxu1 %v495_v47 }
  0x4c   :  { %463 = vmatprep.subr.bf16.mxu1 %v612_v1 }
  0x4d   :  { %444 = vmatpush3.bf16.msra.mxu0 %v488_v23 }
  0x4e   :  { %445 = vmatprep.subr.bf16.mxu0 %v612_v1 }
  0x4f   :  { %464 = vmatpush3.bf16.msra.mxu1 %v496_v48 }
  0x50   :  { %465 = vmatprep.subr.bf16.mxu1 %v612_v1 }
  0x51   :  { %446 = vmatpush3.bf16.msra.mxu0 %v489_v24 }
  0x52   :  { %447 = vmatprep.subr.bf16.mxu0 %v612_v1 }
  0x53   :  { %466 = vmatpush3.bf16.msra.mxu1 %v497_v49 }
  0x54   :  { %467 = vmatprep.subr.bf16.mxu1 %v612_v1 }
  0x55   :  { %448 = vmatpush3.bf16.msra.mxu0 %v490_v25 }
  0x57   :  { %468 = vmatpush3.bf16.msra.mxu1 %v498_v50 }
  0xcc   :  { %v83_v9 = vpop.xlane.xlu0 %82 }
  0xcd   :  { %v86_v10 = vmul.f32 0.03125, %v83_v9 }
  0xcf   :  { %v88_v11 = vsub.f32 %v80_v6, %v86_v10 }
  0xd0   :  { %v85_v12 = vpop.xlane.xlu0 %84 }
  0xd1   :  { %v87_v13 = vmul.f32 0.03125, %v85_v12  ;;  %v90_v14 = vmul.f32 %v392_v3, %v88_v11 }
  0xd3   :  { %v89_v15 = vsub.f32 %v81_v7, %v87_v13  ;;  %v92_v16 = vmul.f32 %v90_v14, %v90_v14 }
  0xd5   :  { %94 = vadd.xlane.f32.xlu1 %v92_v16  ;;  %v91_v17 = vmul.f32 %v392_v3, %v89_v15 }
  0xd7   :  { %v93_v18 = vmul.f32 %v91_v17, %v91_v17 }
  0xd9   :  { %96 = vadd.xlane.f32.xlu1 %v93_v18 }
 0x162   :  { %v95_v26 = vpop.xlane.xlu1 %94 }
 0x163   :  { %v98_v27 = vmul.f32 0.03125, %v95_v26 }
 0x165   :  { %v100_v28 = vadd.f32 1e-05, %v98_v27 }
 0x166   :  { %v97_v29 = vpop.xlane.xlu1 %96 }
 0x167   :  { %499 = vrsqrt.f32 %v100_v28  ;;  %v99_v30 = vmul.f32 0.03125, %v97_v29 }
 0x169   :  { %v101_v31 = vadd.f32 1e-05, %v99_v30 }
 0x16b   :  { %501 = vrsqrt.f32 %v101_v31 }
 0x171   :  { %v500_v32 = vpop.eup %499 }
 0x172   :  { %v104_v33 = vmul.f32 %v500_v32, %v88_v11 }
 0x174   :  { %v113_v37 = vmul.f32 %v393_v34, %v104_v33 }
 0x175   :  { %v502_v35 = vpop.eup %501 }
 0x176   :  { %v105_v36 = vmul.f32 %v502_v35, %v89_v15  ;;  %v122_v40 = vadd.f32 %v394_v38, %v113_v37 }
 0x178   :  { %v114_v39 = vmul.f32 %v393_v34, %v105_v36 }
 0x17a   :  { %v123_v41 = vadd.f32 %v394_v38, %v114_v39 }
 0x17c   :  { %v124_v42 = vpack.c.bf16 %v123_v41, %v122_v40 }
 0x17e   :  { %450 = vmatmul.mubr.bf16.vlgmr.msra.gmra.mrb[0].mxu0 %v124_v42 }
 0x251   :  { %v241_v52 = vpop.f32.mrb[0].mxu0 }
 0x252   :  { %v242_v53 = vadd.f32 %v396_v51, %v241_v52  ;;  %v451_v54 = vpop.f32.mrb[1].mxu0 }
 0x253   :  { %v244_v55 = vpop.f32.mrb[2].mxu0 }
 0x254   :  { %v405_v56 = vmul.f32 -1.442695, %v242_v53  ;;  %v245_v57 = vadd.f32 %v396_v51, %v244_v55  ;;  %v452_v58 = vpop.f32.mrb[3].mxu0 }
 0x256   :  { %503 = vpow2.f32 %v405_v56  ;;  %v406_v59 = vmul.f32 -1.442695, %v245_v57 }
 0x258   :  { %505 = vpow2.f32 %v406_v59 }
 0x260   :  { %v504_v60 = vpop.eup %503 }
 0x261   :  { %v254_v61 = vadd.f32 1.0, %v504_v60 }
 0x262   :  { %v506_v62 = vpop.eup %505 }
 0x263   :  { %507 = vrcp.f32 %v254_v61  ;;  %v255_v63 = vadd.f32 1.0, %v506_v62 }
 0x265   :  { %509 = vrcp.f32 %v255_v63 }
 0x26d   :  { %v508_v0 = vpop.eup %507 }
 0x26e   :  { %v260_v2 = vmul.f32 %v508_v0, %v242_v53 }
 0x26f   :  { %v510_v1 = vpop.eup %509 }
 0x270   :  { %v261_v3 = vmul.f32 %v510_v1, %v245_v57 }
 0x272   :  { %v264_v4 = vpack.c.bf16 %v261_v3, %v260_v2 }
 0x274   :  { %470 = vmatmul.mubr.bf16.vlgmr.msra.gmra.mrb[0].mxu1 %v264_v4 }
 0x347   :  { %v363_v6 = vpop.f32.mrb[0].mxu1 }
 0x348   :  { %v370_v7 = vadd.f32 %v395_v5, %v363_v6  ;;  %v471_v8 = vpop.f32.mrb[1].mxu1 }
 0x349   :  { %v366_v9 = vpop.f32.mrb[2].mxu1 }
 0x34a   :  { %372 = vst [vmem:[#allocation9] sm:$0xff] %v370_v7  ;;  %v371_v10 = vadd.f32 %v395_v5, %v366_v9  ;;  %v472_v11 = vpop.f32.mrb[3].mxu1 }
 0x34c   :  { %373 = vst [vmem:[#allocation9 + $0x8] sm:$0xff] %v371_v10 }
 0x34d   :  { %588 = shalt.err (!%p585_p0)
}
 0x34e   :  { %s589_s24 = scalar_lea.hbm %s753_s7, 256 }
 0x34f   :  { %p590_p1 = scmp.ne.s32.totalorder %s753_s7, %s589_s24  ;;  %p593_p2 = scmp.lt.u32.totalorder %s589_s24, %s753_s7 }
 0x351   :  { %p595_p3 = pnand %p593_p2, %p590_p1 }
 0x353   :  { %598 = shalt.err (!%p595_p3)
}
 0x354   :  { %385 = dma.vmem_to_hbm [thread:$0]  %s380_s21, 256, %s753_s7, [#allocation5], %s609_s3, %s609_s3, %s610_s25  }
 0x355   :  { %603 = dma.done.wait [#allocation5], 256  }
 0x356   :  { %604 = vsyncadd [#allocation5], 4294967040 }
 0x357   :  { %389 = vsyncpa [#allocation4], 1 }
 0x358   :  { %390 = vsyncpa [#allocation7], 1 }
 0x359   :  { %391 = vsyncpa [#allocation5], 1 }

</bundles_post_ra>
